<compile_context>
chip_gen: v6e
topology: v6e:2x2x1
jax: 0.10.0
libtpu: 0.0.40
codegen_flags: <defaults>
</compile_context>

<pallas_src>
import functools
import numpy as np

import jax
import jax.numpy as jnp
from jax.experimental import pallas as pl
from jax.experimental.pallas import tpu as pltpu


def _rup(x, m):
    return ((x + m - 1) // m) * m


def _row_tile(m, cap=512):
    return min(cap, _rup(m, 8))


# ----------------------------------------------------------------------------- #
# Fused matmul kernel: [LayerNorm prologue] -> bf16 MXU dot -> scale/bias ->
#                      [residual add] -> activation -> store (f32 or bf16)
# ----------------------------------------------------------------------------- #
def _mm_kernel(act, has_ln, has_res, *refs):
    a_ref = refs[0]
    i = 1
    if has_ln:
        g_ref, bl_ref = refs[1], refs[2]
        i = 3
    b_ref, s_ref, c_ref = refs[i], refs[i + 1], refs[i + 2]
    i += 3
    r_ref = refs[i] if has_res else None
    o_ref = refs[-1]

    a = a_ref[...]
    if has_ln:
        a = a.astype(jnp.float32)
        mu = jnp.mean(a, axis=-1, keepdims=True)
        d = a - mu
        var = jnp.mean(d * d, axis=-1, keepdims=True)
        a = d * jax.lax.rsqrt(var + 1e-5) * g_ref[...] + bl_ref[...]

    y = jnp.dot(a.astype(jnp.bfloat16), b_ref[...],
                preferred_element_type=jnp.float32)
    y = y * s_ref[...] + c_ref[...]
    if has_res:
        y = y + r_ref[...].astype(jnp.float32)
    if act == "relu":
        y = jnp.maximum(y, 0.0)
    elif act == "sigmoid":
        y = jax.nn.sigmoid(y)
    o_ref[...] = y.astype(o_ref.dtype)


@functools.partial(jax.jit, static_argnames=("act", "out_dtype"))
def matmul_fused(a, b, scale=None, bias=None, *, act="none", ln=None,
                 residual=None, out_dtype=jnp.float32):
    """y = act( [LN](a) @ b * scale + bias [+ residual] ), scale/bias per column."""
    M, K = a.shape
    N = b.shape[1]
    if scale is None:
        scale = jnp.ones((N,), jnp.float32)
    if bias is None:
        bias = jnp.zeros((N,), jnp.float32)

    has_ln = ln is not None
    has_res = residual is not None

    b16 = b.astype(jnp.bfloat16)
    a_in = a.astype(jnp.float32) if has_ln else a.astype(jnp.bfloat16)

    # Pad K only to the sublane multiple (8); never to 128 (full-dim blocks).
    kpad = (-K) % 8
    if kpad and not has_ln:
        a_in = jnp.pad(a_in, ((0, 0), (0, kpad)))
        b16 = jnp.pad(b16, ((0, kpad), (0, 0)))
        Kp = K + kpad
    else:
        Kp = K

    s2 = scale.astype(jnp.float32).reshape(1, N)
    c2 = bias.astype(jnp.float32).reshape(1, N)

    itm_a = 4 if has_ln else 2
    itm_out = jnp.dtype(out_dtype).itemsize
    itm_res = jnp.dtype(residual.dtype).itemsize if has_res else 0

    tm = min(128 if Kp > 2048 else 256, _rup(M, 8))
    b_bytes = Kp * N * 2
    row_bytes = tm * (Kp * itm_a + N * (itm_out + itm_res))
    resident = 2 * (b_bytes + row_bytes) <= 14 * 1024 * 1024

    kern = functools.partial(_mm_kernel, act, has_ln, has_res)

    if resident:
        # Weight panel (and scale/bias) have constant index maps -> loaded once,
        # stays in VMEM; output block is the full N (lane-dense where N >= 128).
        grid = (pl.cdiv(M, tm),)
        in_specs = [pl.BlockSpec((tm, Kp), lambda i: (i, 0))]
        args = [a_in]
        if has_ln:
            g, be = ln
            in_specs += [pl.BlockSpec((1, Kp), lambda i: (0, 0)),
                         pl.BlockSpec((1, Kp), lambda i: (0, 0))]
            args += [g.astype(jnp.float32).reshape(1, Kp),
                     be.astype(jnp.float32).reshape(1, Kp)]
        in_specs += [pl.BlockSpec((Kp, N), lambda i: (0, 0)),
                     pl.BlockSpec((1, N), lambda i: (0, 0)),
                     pl.BlockSpec((1, N), lambda i: (0, 0))]
        args += [b16, s2, c2]
        if has_res:
            in_specs += [pl.BlockSpec((tm, N), lambda i: (i, 0))]
            args += [residual]
        out_spec = pl.BlockSpec((tm, N), lambda i: (i, 0))
        dimsem = ("parallel",)
    else:
        tn = max(128, min(512, _rup(N, 128)))
        grid = (pl.cdiv(M, tm), pl.cdiv(N, tn))
        in_specs = [pl.BlockSpec((tm, Kp), lambda i, j: (i, 0))]
        args = [a_in]
        if has_ln:
            g, be = ln
            in_specs += [pl.BlockSpec((1, Kp), lambda i, j: (0, 0)),
                         pl.BlockSpec((1, Kp), lambda i, j: (0, 0))]
            args += [g.astype(jnp.float32).reshape(1, Kp),
                     be.astype(jnp.float32).reshape(1, Kp)]
        in_specs += [pl.BlockSpec((Kp, tn), lambda i, j: (0, j)),
                     pl.BlockSpec((1, tn), lambda i, j: (0, j)),
                     pl.BlockSpec((1, tn), lambda i, j: (0, j))]
        args += [b16, s2, c2]
        if has_res:
            in_specs += [pl.BlockSpec((tm, tn), lambda i, j: (i, j))]
            args += [residual]
        out_spec = pl.BlockSpec((tm, tn), lambda i, j: (i, j))
        dimsem = ("parallel", "parallel")

    return pl.pallas_call(
        kern,
        out_shape=jax.ShapeDtypeStruct((M, N), out_dtype),
        grid=grid,
        in_specs=in_specs,
        out_specs=out_spec,
        compiler_params=pltpu.CompilerParams(dimension_semantics=dimsem),
    )(*args)


# ----------------------------------------------------------------------------- #
# Small batched matmul (token pooling), bf16 on the MXU
# ----------------------------------------------------------------------------- #
def _bmm_kernel(a_ref, b_ref, o_ref):
    o_ref[0] = jnp.dot(a_ref[0], b_ref[0], preferred_element_type=jnp.float32)


@jax.jit
def bmm_full(a, b):
    G, M, K = a.shape
    N = b.shape[2]
    a16 = a.astype(jnp.bfloat16)
    b16 = b.astype(jnp.bfloat16)
    return pl.pallas_call(
        _bmm_kernel,
        out_shape=jax.ShapeDtypeStruct((G, M, N), jnp.float32),
        grid=(G,),
        in_specs=[pl.BlockSpec((1, M, K), lambda g: (g, 0, 0)),
                  pl.BlockSpec((1, K, N), lambda g: (g, 0, 0))],
        out_specs=pl.BlockSpec((1, M, N), lambda g: (g, 0, 0)),
        compiler_params=pltpu.CompilerParams(dimension_semantics=("parallel",)),
    )(a16, b16)


# ----------------------------------------------------------------------------- #
# Elementwise / attention kernels
# ----------------------------------------------------------------------------- #
def _pa_gate_kernel(x_ref, s_ref, b_ref, w_ref, c_ref, o_ref):
    x0 = x_ref[...]
    h = jnp.maximum(x0 * s_ref[...] + b_ref[...], 0.0)          # BN + ReLU
    o_ref[...] = x0 * jax.nn.sigmoid(h * w_ref[...] + c_ref[...])


@jax.jit
def pa_gate_pallas(x0, bn_s, bn_b, pa_w, pa_b):
    """Fused PA head: x0 * sigmoid(pa_conv(relu(bn(x0)))), lane-dense repack."""
    M, C = x0.shape
    rep = 1
    if C < 128 and (128 % C) == 0 and (M % (128 // C)) == 0:
        rep = 128 // C
    Mr, Cr = M // rep, C * rep
    x2 = x0.astype(jnp.float32).reshape(Mr, Cr)
    tile = lambda v: jnp.tile(v.astype(jnp.float32), rep).reshape(1, Cr)
    tr = _row_tile(Mr, 1024)
    vec = lambda: pl.BlockSpec((1, Cr), lambda i: (0, 0))
    out = pl.pallas_call(
        _pa_gate_kernel,
        out_shape=jax.ShapeDtypeStruct((Mr, Cr), jnp.float32),
        grid=(pl.cdiv(Mr, tr),),
        in_specs=[pl.BlockSpec((tr, Cr), lambda i: (i, 0)),
                  vec(), vec(), vec(), vec()],
        out_specs=pl.BlockSpec((tr, Cr), lambda i: (i, 0)),
        compiler_params=pltpu.CompilerParams(dimension_semantics=("parallel",)),
    )(x2, tile(bn_s), tile(bn_b), tile(pa_w), tile(pa_b))
    return out.reshape(M, C)


def _softmax_kernel(x_ref, o_ref):
    x = x_ref[...]
    m = jnp.max(x, axis=-1, keepdims=True)
    e = jnp.exp(x - m)
    o_ref[...] = e / jnp.sum(e, axis=-1, keepdims=True)


@jax.jit
def softmax_pallas(x):
    R, N = x.shape
    tr = _row_tile(R)
    return pl.pallas_call(
        _softmax_kernel,
        out_shape=jax.ShapeDtypeStruct((R, N), jnp.float32),
        grid=(pl.cdiv(R, tr),),
        in_specs=[pl.BlockSpec((tr, N), lambda i: (i, 0))],
        out_specs=pl.BlockSpec((tr, N), lambda i: (i, 0)),
        compiler_params=pltpu.CompilerParams(dimension_semantics=("parallel",)),
    )(x.astype(jnp.float32))


def _enc_attn_kernel(scale, nm, q_ref, k_ref, v_ref, o_ref):
    """Few-token self-attention; all B*heads groups processed in one block."""
    q = q_ref[...]                 # (G, n, d)
    k = k_ref[...]                 # (G, nm, d)
    v = v_ref[...]
    dots = [jnp.sum(q * k[:, j:j + 1, :], axis=-1, keepdims=True) * scale
            for j in range(nm)]
    m = dots[0]
    for j in range(1, nm):
        m = jnp.maximum(m, dots[j])
    es = [jnp.exp(d - m) for d in dots]
    den = es[0]
    num = es[0] * v[:, 0:1, :]
    for j in range(1, nm):
        den = den + es[j]
        num = num + es[j] * v[:, j:j + 1, :]
    o_ref[...] = num / den


@functools.partial(jax.jit, static_argnames=("scale",))
def enc_attn_pallas(q, k, v, *, scale):
    G, n, d = q.shape
    nm = k.shape[1]
    full = lambda s: pl.BlockSpec(s, lambda i: (0, 0, 0))
    return pl.pallas_call(
        functools.partial(_enc_attn_kernel, scale, nm),
        out_shape=jax.ShapeDtypeStruct((G, n, d), jnp.float32),
        grid=(1,),
        in_specs=[full((G, n, d)), full((G, nm, d)), full((G, nm, d))],
        out_specs=full((G, n, d)),
    )(q.astype(jnp.float32), k.astype(jnp.float32), v.astype(jnp.float32))


def _dec_attn_kernel(scale, nm, q_ref, k_ref, v_ref, o_ref):
    """Decoder cross-attention (dim_head=1): channels==heads, n on the lane dim."""
    q = q_ref[...] * scale         # (B, h, n)
    k = k_ref[...]                 # (B, h, nm)
    v = v_ref[...]
    dots = [q * k[:, :, j:j + 1] for j in range(nm)]
    m = dots[0]
    for j in range(1, nm):
        m = jnp.maximum(m, dots[j])
    es = [jnp.exp(d - m) for d in dots]
    den = es[0]
    num = es[0] * v[:, :, 0:1]
    for j in range(1, nm):
        den = den + es[j]
        num = num + es[j] * v[:, :, j:j + 1]
    o_ref[...] = num / den


@functools.partial(jax.jit, static_argnames=("scale",))
def dec_attn_pallas(q, k, v, *, scale):
    B, n, h = q.shape
    nm = k.shape[1]
    qT = jnp.transpose(q, (0, 2, 1)).astype(jnp.float32)   # (B, h, n) lane-dense
    kT = jnp.transpose(k, (0, 2, 1)).astype(jnp.float32)
    vT = jnp.transpose(v, (0, 2, 1)).astype(jnp.float32)
    full = lambda s: pl.BlockSpec(s, lambda i: (0, 0, 0))
    out = pl.pallas_call(
        functools.partial(_dec_attn_kernel, scale, nm),
        out_shape=jax.ShapeDtypeStruct((B, h, n), jnp.float32),
        grid=(1,),
        in_specs=[full((B, h, n)), full((B, h, nm)), full((B, h, nm))],
        out_specs=full((B, h, n)),
    )(qT, kT, vT)
    return jnp.transpose(out, (0, 2, 1))


# ----------------------------------------------------------------------------- #
# NN building blocks (glue around the Pallas kernels)
# ----------------------------------------------------------------------------- #
def _im2col(x, kh, kw, stride, padding, dilation):
    # TODO(synk): patch extraction kept as XLA slicing/concat (bf16, no K-pad);
    # in-kernel tap accumulation with shifted reads would remove the kh*kw
    # activation duplication entirely.
    x = x.astype(jnp.bfloat16)
    B, H, W, C = x.shape
    Ho = (H + 2 * padding - dilation * (kh - 1) - 1) // stride + 1
    Wo = (W + 2 * padding - dilation * (kw - 1) - 1) // stride + 1
    if kh == 1 and kw == 1 and stride == 1 and padding == 0:
        return x.reshape(B * Ho * Wo, C), (B, Ho, Wo)
    xp = jnp.pad(x, ((0, 0), (padding, padding), (padding, padding), (0, 0)))
    cols = []
    for i in range(kh):
        for j in range(kw):
            cols.append(
                xp[:, i * dilation: i * dilation + (Ho - 1) * stride + 1: stride,
                      j * dilation: j * dilation + (Wo - 1) * stride + 1: stride, :])
    patches = jnp.concatenate(cols, axis=-1)
    return patches.reshape(B * Ho * Wo, kh * kw * C), (B, Ho, Wo)


def conv2d(x, w, stride=1, padding=0, dilation=1, scale=None, bias=None,
           act="none", residual=None, out_dtype=jnp.bfloat16):
    """Conv as im2col (bf16) + fused matmul; BN/bias/residual/activation fused."""
    kh, kw, cin, cout = w.shape
    cols, (B, Ho, Wo) = _im2col(x, kh, kw, stride, padding, dilation)
    w2 = w.reshape(kh * kw * cin, cout)
    res2 = residual.reshape(-1, cout) if residual is not None else None
    y = matmul_fused(cols, w2, scale, bias, act=act, residual=res2,
                     out_dtype=out_dtype)
    return y.reshape(B, Ho, Wo, cout)


def bn_scale_bias(p):
    s = p["gamma"] / jnp.sqrt(p["var"] + 1e-5)
    return s, p["beta"] - p["mean"] * s


def maxpool3x3_s2(x):
    # TODO(synk): 3x3/s2 max-pool kept as lax.reduce_window (tiny op, no Pallas kernel).
    neg = jnp.asarray(-jnp.inf, x.dtype)
    return jax.lax.reduce_window(x, neg, jax.lax.max,
                                 (1, 3, 3, 1), (1, 2, 2, 1),
                                 ((0, 0), (1, 1), (1, 1), (0, 0)))


def gelu_exact(x):
    # TODO(synk): exact erf-GELU applied in plain JAX (erf lowering inside Mosaic not relied on).
    return 0.5 * x * (1.0 + jax.lax.erf(x / jnp.sqrt(jnp.float32(2.0))))


def _cubic(x, A=-0.75):
    x = abs(float(x))
    if x <= 1.0:
        return ((A + 2.0) * x - (A + 3.0)) * x * x + 1.0
    elif x < 2.0:
        return ((A * x - 5.0 * A) * x + 8.0 * A) * x - 4.0 * A
    return 0.0


def _bicubic_matrix(out_size, in_size):
    """PyTorch-style bicubic (A=-0.75), align_corners=True, clamped borders."""
    Wm = np.zeros((out_size, in_size), np.float32)
    for o in range(out_size):
        src = 0.0 if out_size == 1 else o * (in_size - 1) / (out_size - 1)
        base = int(np.floor(src))
        t = src - base
        for k in range(-1, 3):
            idx = min(max(base + k, 0), in_size - 1)
            Wm[o, idx] += _cubic(k - t)
    return jnp.asarray(Wm)


def resize_bicubic(x, oh, ow, out_dtype=jnp.float32):
    """Separable bicubic resize (align_corners=True) as two fused Pallas matmuls."""
    B, H, W, C = x.shape
    Wh = _bicubic_matrix(oh, H)
    Ww = _bicubic_matrix(ow, W)
    t = x.transpose(1, 0, 2, 3).reshape(H, B * W * C)
    t = matmul_fused(Wh, t).reshape(oh, B, W, C)
    t = t.transpose(2, 0, 1, 3).reshape(W, oh * B * C)
    t = matmul_fused(Ww, t, out_dtype=out_dtype).reshape(ow, oh, B, C)
    return t.transpose(2, 1, 0, 3)


# ----------------------------------------------------------------------------- #
# Deterministic parameter construction
# ----------------------------------------------------------------------------- #
class KeyGen:
    def __init__(self, seed):
        self.key = jax.random.PRNGKey(seed)

    def __call__(self):
        self.key, sub = jax.random.split(self.key)
        return sub


KG = KeyGen(1)


def conv_init(kh, kw, cin, cout):
    n = kh * kw * cout
    return jax.random.normal(KG(), (kh, kw, cin, cout), jnp.float32) * np.sqrt(2.0 / n)


def lin_init(cin, cout):
    return jax.random.normal(KG(), (cin, cout), jnp.float32) / np.sqrt(cin)


def vec_init(c, scale=0.1):
    return jax.random.normal(KG(), (c,), jnp.float32) * scale


def bn_init(c):
    return dict(gamma=jnp.ones((c,), jnp.float32), beta=jnp.zeros((c,), jnp.float32),
                mean=jnp.zeros((c,), jnp.float32), var=jnp.ones((c,), jnp.float32))


# ----------------------------------------------------------------------------- #
# ResNet-18 backbone (output_stride = 16) + PA heads
# ----------------------------------------------------------------------------- #
def make_basic_block(cin, cout, stride, dilation, downsample):
    p = dict(stride=stride, dilation=dilation,
             conv1_w=conv_init(3, 3, cin, cout), bn1=bn_init(cout),
             conv2_w=conv_init(3, 3, cout, cout), bn2=bn_init(cout))
    if downsample:
        p["down_w"] = conv_init(1, 1, cin, cout)
        p["down_bn"] = bn_init(cout)
    return p


def basic_block_fwd(x, p):
    s, d = p["stride"], p["dilation"]
    s1, b1 = bn_scale_bias(p["bn1"])
    out1 = conv2d(x, p["conv1_w"], stride=s, padding=d, dilation=d,
                  scale=s1, bias=b1, act="relu")
    if "down_w" in p:
        sd, bd = bn_scale_bias(p["down_bn"])
        idn = conv2d(x, p["down_w"], stride=s, padding=0, scale=sd, bias=bd)
    else:
        idn = x
    s2, b2 = bn_scale_bias(p["bn2"])
    # residual add + ReLU fused into the second conv's epilogue
    return conv2d(out1, p["conv2_w"], stride=1, padding=1, dilation=1,
                  scale=s2, bias=b2, act="relu", residual=idn)


def make_pa(cin, cout=32):
    return dict(conv_w=conv_init(3, 3, cin, cout), bn=bn_init(cout),
                pa_w=vec_init(cout, 0.5), pa_b=vec_init(cout, 0.1))


def pa_fwd(x, p):
    x0 = conv2d(x, p["conv_w"], padding=1, out_dtype=jnp.float32)   # x0 reused raw
    B, H, W, C = x0.shape
    s1, b1 = bn_scale_bias(p["bn"])
    # Dropout2d(0.2) is identity in inference; BN+ReLU+grouped-1x1+sigmoid+gate fused.
    out = pa_gate_pallas(x0.reshape(-1, C), s1, b1, p["pa_w"], p["pa_b"])
    return out.reshape(B, H, W, C)


def make_resnet18(in_c=3):
    p = dict(conv1_w=conv_init(7, 7, in_c, 64), bn1=bn_init(64))
    p["layer1"] = [make_basic_block(64, 64, 1, 1, False),
                   make_basic_block(64, 64, 1, 1, False)]
    p["layer2"] = [make_basic_block(64, 128, 2, 1, True),
                   make_basic_block(128, 128, 1, 1, False)]
    p["layer3"] = [make_basic_block(128, 256, 2, 1, True),
                   make_basic_block(256, 256, 1, 1, False)]
    # output_stride=16: layer4 stride 1, multi-grid dilations [1,2,4] * 2 = [2,4,8]
    p["layer4"] = [make_basic_block(256, 512, 1, 2, True),
                   make_basic_block(512, 512, 1, 4, False),
                   make_basic_block(512, 512, 1, 8, False)]
    p["pos_s16"] = make_pa(512, 32)
    p["pos_s8"] = make_pa(128, 32)
    p["pos_s4"] = make_pa(64, 32)
    return p


def resnet18_fwd(x, p):
    s1, b1 = bn_scale_bias(p["bn1"])
    x = conv2d(x, p["conv1_w"], stride=2, padding=3, scale=s1, bias=b1, act="relu")
    x = maxpool3x3_s2(x)
    for bp in p["layer1"]:
        x = basic_block_fwd(x, bp)
    low2 = x
    for bp in p["layer2"]:
        x = basic_block_fwd(x, bp)
    low3 = x
    for bp in p["layer3"]:
        x = basic_block_fwd(x, bp)
    for bp in p["layer4"]:
        x = basic_block_fwd(x, bp)
    return pa_fwd(x, p["pos_s16"]), pa_fwd(low3, p["pos_s8"]), pa_fwd(low2, p["pos_s4"])


# ----------------------------------------------------------------------------- #
# Context aggregator: token encoder / decoder transformers
# ----------------------------------------------------------------------------- #
def make_token_encoder(in_chan=32, token_len=4, heads=8, dim_head=64, mlp_dim=64):
    inner = heads * dim_head
    return dict(
        conv_a_w=conv_init(1, 1, in_chan, token_len), conv_a_b=vec_init(token_len, 0.1),
        pos_embedding=jax.random.normal(KG(), (1, token_len, in_chan), jnp.float32),
        ln1_g=jnp.ones((in_chan,), jnp.float32), ln1_b=jnp.zeros((in_chan,), jnp.float32),
        to_qkv_w=lin_init(in_chan, inner * 3),
        to_out_w=lin_init(inner, in_chan), to_out_b=vec_init(in_chan, 0.1),
        ln2_g=jnp.ones((in_chan,), jnp.float32), ln2_b=jnp.zeros((in_chan,), jnp.float32),
        ff_w1=lin_init(in_chan, mlp_dim), ff_b1=vec_init(mlp_dim, 0.1),
        ff_w2=lin_init(mlp_dim, in_chan), ff_b2=vec_init(in_chan, 0.1),
        heads=heads, dim_head=dim_head)


def _mh_attention(t, p):
    """t = Attention(LN(t)) + t; LN fused into the qkv matmul, residual into to_out."""
    B, n, C = t.shape
    h, dh = p["heads"], p["dim_head"]
    inner = h * dh
    t2 = t.reshape(B * n, C)
    qkv = matmul_fused(t2, p["to_qkv_w"], ln=(p["ln1_g"], p["ln1_b"])
                       ).reshape(B, n, 3 * inner)
    q, k, v = qkv[..., :inner], qkv[..., inner:2 * inner], qkv[..., 2 * inner:]

    def split_heads(a):
        return a.reshape(B, n, h, dh).transpose(0, 2, 1, 3).reshape(B * h, n, dh)

    q, k, v = split_heads(q), split_heads(k), split_heads(v)
    out = enc_attn_pallas(q, k, v, scale=float(dh) ** -0.5)
    out = out.reshape(B, h, n, dh).transpose(0, 2, 1, 3).reshape(B * n, inner)
    out = matmul_fused(out, p["to_out_w"], None, p["to_out_b"], residual=t2)
    return out.reshape(B, n, C)


def _feedforward(t, ln_g, ln_b, w1, b1, w2, b2):
    """t = FF(LN(t)) + t; LN fused into ff1, residual into ff2."""
    B, n, C = t.shape
    t2 = t.reshape(B * n, C)
    h = matmul_fused(t2, w1, None, b1, ln=(ln_g, ln_b))
    h = gelu_exact(h)
    out = matmul_fused(h, w2, None, b2, residual=t2)
    return out.reshape(B, n, C)


def token_encoder_fwd(x, p):
    B, H, W, C = x.shape
    sa = conv2d(x, p["conv_a_w"], padding=0, bias=p["conv_a_b"],
                out_dtype=jnp.float32)                              # (B,H,W,token_len)
    L = sa.shape[-1]
    sa = sa.transpose(0, 3, 1, 2).reshape(B * L, H * W)
    sa = softmax_pallas(sa).reshape(B, L, H * W)
    xf = x.astype(jnp.float32).reshape(B, H * W, C)
    tokens = bmm_full(sa, xf) + p["pos_embedding"]                  # einsum('bln,bnc->blc')
    # Transformer depth=1: Residual(PreNorm(Attention)), Residual(PreNorm(FF))
    t = _mh_attention(tokens, p)
    t = _feedforward(t, p["ln2_g"], p["ln2_b"],
                     p["ff_w1"], p["ff_b1"], p["ff_w2"], p["ff_b2"])
    return t


def make_token_decoder(in_chan, size, heads=8):
    inner = heads * int(True)   # reference passes dim_head=True  ->  inner_dim = 8
    return dict(
        pos=jax.random.normal(KG(), (1, size, size, in_chan), jnp.float32),
        ln1_g=jnp.ones((in_chan,), jnp.float32), ln1_b=jnp.zeros((in_chan,), jnp.float32),
        to_q_w=lin_init(in_chan, inner), to_k_w=lin_init(in_chan, inner),
        to_v_w=lin_init(in_chan, inner),
        to_out_w=lin_init(inner, in_chan), to_out_b=vec_init(in_chan, 0.1),
        ln2_g=jnp.ones((in_chan,), jnp.float32), ln2_b=jnp.zeros((in_chan,), jnp.float32),
        ff_w1=lin_init(in_chan, in_chan * 2), ff_b1=vec_init(in_chan * 2, 0.1),
        ff_w2=lin_init(in_chan * 2, in_chan), ff_b2=vec_init(in_chan, 0.1),
        heads=heads, inner=inner)


def _cross_attention(xs, m, p, dim):
    """xs = CrossAttention(LN(xs), LN(m)) + xs (shared LN, dim_head=1 quirk)."""
    B, n, C = xs.shape
    nm = m.shape[1]
    inner = p["inner"]                       # 8, heads=8 -> per-head dim 1
    ln = (p["ln1_g"], p["ln1_b"])
    xs2 = xs.reshape(B * n, C)
    q = matmul_fused(xs2, p["to_q_w"], ln=ln).reshape(B, n, inner)
    kv_w = jnp.concatenate([p["to_k_w"], p["to_v_w"]], axis=1)
    kv = matmul_fused(m.reshape(B * nm, C), kv_w, ln=ln).reshape(B, nm, 2 * inner)
    k, v = kv[..., :inner], kv[..., inner:]
    att = dec_attn_pallas(q, k, v, scale=float(dim) ** -0.5)
    out = matmul_fused(att.reshape(B * n, inner), p["to_out_w"], None,
                       p["to_out_b"], residual=xs2)
    return out.reshape(B, n, C)


def token_decoder_fwd(x, tokens, p):
    B, H, W, C = x.shape
    x = x.astype(jnp.float32) + p["pos"]
    xs = x.reshape(B, H * W, C)
    xs = _cross_attention(xs, tokens, p, dim=C)
    xs = _feedforward(xs, p["ln2_g"], p["ln2_b"],
                      p["ff_w1"], p["ff_b1"], p["ff_w2"], p["ff_b2"])
    return xs.reshape(B, H, W, C)


def make_ca(in_chan, size):
    return dict(enc=make_token_encoder(in_chan, token_len=4),
                dec=make_token_decoder(32, size, heads=8))


def ca_fwd(feat, p):
    tokens = token_encoder_fwd(feat, p["enc"])
    return token_decoder_fwd(feat, tokens, p["dec"])


# ----------------------------------------------------------------------------- #
# Classifier head + full MSCANet
# ----------------------------------------------------------------------------- #
def make_classifier(in_chan=32, n_class=2):
    return dict(conv1_w=conv_init(3, 3, in_chan * 2, in_chan), bn=bn_init(in_chan),
                conv2_w=conv_init(3, 3, in_chan, n_class), conv2_b=vec_init(n_class, 0.1))


def classifier_fwd(x, p):
    s, b = bn_scale_bias(p["bn"])
    h = conv2d(x, p["conv1_w"], padding=1, scale=s, bias=b, act="relu")
    return conv2d(h, p["conv2_w"], padding=1, bias=p["conv2_b"],
                  out_dtype=jnp.float32)


def make_mscanet(img_size=32, img_chan=3, chan_num=32, n_class=2):
    return dict(
        backbone=make_resnet18(img_chan),
        CA_s16=make_ca(chan_num, img_size // 16),
        CA_s8=make_ca(chan_num, img_size // 8),
        CA_s4=make_ca(chan_num, img_size // 4),
        conv_s8_w=conv_init(3, 3, chan_num * 2, chan_num), conv_s8_b=vec_init(chan_num, 0.1),
        conv_s4_w=conv_init(3, 3, chan_num * 2, chan_num), conv_s4_b=vec_init(chan_num, 0.1),
        classifier1=make_classifier(chan_num, n_class),
        classifier2=make_classifier(chan_num, n_class),
        classifier3=make_classifier(chan_num, n_class))


def mscanet_fwd(params, img1_nchw, img2_nchw):
    img1 = jnp.transpose(img1_nchw, (0, 2, 3, 1)).astype(jnp.float32)
    img2 = jnp.transpose(img2_nchw, (0, 2, 3, 1)).astype(jnp.float32)
    B0, H, W = img1.shape[0], img1.shape[1], img1.shape[2]

    # Siamese batching: both images share every weight panel / kernel launch.
    imgs = jnp.concatenate([img1, img2], axis=0)                    # (2B, H, W, C)
    o_s16, o_s8, o_s4 = resnet18_fwd(imgs, params["backbone"])

    x_s16 = ca_fwd(o_s16, params["CA_s16"])                         # (2B, h16, w16, 32)
    x16 = jnp.concatenate([x_s16[:B0], x_s16[B0:]], axis=-1)        # (B, h16, w16, 64)
    x16 = resize_bicubic(x16, H, W, out_dtype=jnp.bfloat16)
    x16 = classifier_fwd(x16, params["classifier1"])

    u = resize_bicubic(x_s16, x_s16.shape[1] * 2, x_s16.shape[2] * 2)
    out_s8 = conv2d(jnp.concatenate([u, o_s8], axis=-1),
                    params["conv_s8_w"], padding=1, bias=params["conv_s8_b"],
                    out_dtype=jnp.float32)
    x_s8 = ca_fwd(out_s8, params["CA_s8"])
    x8 = jnp.concatenate([x_s8[:B0], x_s8[B0:]], axis=-1)
    x8 = resize_bicubic(x8, H, W, out_dtype=jnp.bfloat16)
    x8 = classifier_fwd(x8, params["classifier2"])

    u = resize_bicubic(x_s8, x_s8.shape[1] * 2, x_s8.shape[2] * 2)
    out_s4 = conv2d(jnp.concatenate([u, o_s4], axis=-1),
                    params["conv_s4_w"], padding=1, bias=params["conv_s4_b"],
                    out_dtype=jnp.float32)
    x_s4 = ca_fwd(out_s4, params["CA_s4"])
    x = jnp.concatenate([x_s4[:B0], x_s4[B0:]], axis=-1)
    x = resize_bicubic(x, H, W, out_dtype=jnp.bfloat16)
    x = classifier_fwd(x, params["classifier3"])

    to_nchw = lambda t: jnp.transpose(t, (0, 3, 1, 2))
    return to_nchw(x), to_nchw(x8), to_nchw(x16)


# ----------------------------------------------------------------------------- #
if __name__ == "__main__":
    B, C, S = 1, 3, 32          # small image size; scale factors 4/8/16 still divide evenly
    key = jax.random.PRNGKey(0)
    k1, k2 = jax.random.split(key)
    img1 = jax.random.normal(k1, (B, C, S, S), jnp.float32)
    img2 = jax.random.normal(k2, (B, C, S, S), jnp.float32)

    params = make_mscanet(img_size=S, img_chan=C, chan_num=32, n_class=2)

    x, x8, x16 = mscanet_fwd(params, img1, img2)
    jax.block_until_ready((x, x8, x16))

    assert x.shape == (B, 2, S, S)
    assert x8.shape == (B, 2, S, S)
    assert x16.shape == (B, 2, S, S)
    print("KERNEL_OK")
</pallas_src>

<mosaic_0001>
module attributes {stable_mosaic.version = 11 : i64} {
  func.func @_mm_kernel(%arg0: i32, %arg1: memref<256x152xbf16, #tpu.memory_space<vmem>>, %arg2: memref<152x64xbf16, #tpu.memory_space<vmem>>, %arg3: memref<1x64xf32, #tpu.memory_space<vmem>>, %arg4: memref<1x64xf32, #tpu.memory_space<vmem>>, %arg5: memref<256x64xbf16, #tpu.memory_space<vmem>>) attributes {dimension_semantics = [#tpu.dimension_semantics<parallel>], iteration_bounds = array<i64: 2>, scalar_prefetch = 0 : i64, scratch_operands = 0 : i64, tpu.core_type = #tpu.core_type<tc>, window_params = [{transform_indices = @transform_0, window_bounds = array<i64: 256, 152>}, {pipeline_mode = #tpu.pipeline_mode<synchronous>, transform_indices = @transform_1, window_bounds = array<i64: 152, 64>}, {pipeline_mode = #tpu.pipeline_mode<synchronous>, transform_indices = @transform_2, window_bounds = array<i64: 1, 64>}, {pipeline_mode = #tpu.pipeline_mode<synchronous>, transform_indices = @transform_3, window_bounds = array<i64: 1, 64>}, {transform_indices = @transform_4, window_bounds = array<i64: 256, 64>}]} {
    %c0 = arith.constant 0 : index
    %c0_0 = arith.constant 0 : index
    %0 = vector.load %arg1[%c0, %c0_0] : memref<256x152xbf16, #tpu.memory_space<vmem>>, vector<256x152xbf16>
    %c0_1 = arith.constant 0 : index
    %c0_2 = arith.constant 0 : index
    %1 = vector.load %arg2[%c0_1, %c0_2] : memref<152x64xbf16, #tpu.memory_space<vmem>>, vector<152x64xbf16>
    %cst = arith.constant dense<0.000000e+00> : vector<256x64xf32>
    %2 = tpu.matmul %0, %1, %cst {dimension_numbers = #tpu.dot_dimension_numbers<[1], [0], [0], [1], [0, 0, 1, 1], [], []>} : vector<256x152xbf16>, vector<152x64xbf16>, vector<256x64xf32> -> vector<256x64xf32>
    %c0_3 = arith.constant 0 : index
    %c0_4 = arith.constant 0 : index
    %3 = vector.load %arg3[%c0_3, %c0_4] : memref<1x64xf32, #tpu.memory_space<vmem>>, vector<1x64xf32>
    %4 = vector.broadcast %3 : vector<1x64xf32> to vector<256x64xf32>
    %5 = arith.mulf %2, %4 : vector<256x64xf32>
    %c0_5 = arith.constant 0 : index
    %c0_6 = arith.constant 0 : index
    %6 = vector.load %arg4[%c0_5, %c0_6] : memref<1x64xf32, #tpu.memory_space<vmem>>, vector<1x64xf32>
    %7 = vector.broadcast %6 : vector<1x64xf32> to vector<256x64xf32>
    %8 = arith.addf %5, %7 : vector<256x64xf32>
    %cst_7 = arith.constant 0.000000e+00 : f32
    %9 = vector.broadcast %cst_7 : f32 to vector<256x64xf32>
    %10 = arith.maximumf %8, %9 : vector<256x64xf32>
    %11 = arith.truncf %10 : vector<256x64xf32> to vector<256x64xbf16>
    %c0_8 = arith.constant 0 : index
    %c0_9 = arith.constant 0 : index
    %12 = vector.load %arg5[%c0_8, %c0_9] : memref<256x64xbf16, #tpu.memory_space<vmem>>, vector<256x64xbf16>
    tpu.vector_store %arg5[%c0_8, %c0_9], %11 {strides = array<i32>} : memref<256x64xbf16, #tpu.memory_space<vmem>>, vector<256x64xbf16>,
    return
  }
  func.func @transform_0(%arg0: i32) -> (i32, i32) {
    %c0_i32 = arith.constant 0 : i32
    %c0_i32_0 = arith.constant 0 : i32
    return %arg0, %c0_i32 : i32, i32
  }
  func.func @transform_1(%arg0: i32) -> (i32, i32) {
    %c0_i32 = arith.constant 0 : i32
    %c0_i32_0 = arith.constant 0 : i32
    %c0_i32_1 = arith.constant 0 : i32
    return %c0_i32, %c0_i32_0 : i32, i32
  }
  func.func @transform_2(%arg0: i32) -> (i32, i32) {
    %c0_i32 = arith.constant 0 : i32
    %c0_i32_0 = arith.constant 0 : i32
    %c0_i32_1 = arith.constant 0 : i32
    return %c0_i32, %c0_i32_0 : i32, i32
  }
  func.func @transform_3(%arg0: i32) -> (i32, i32) {
    %c0_i32 = arith.constant 0 : i32
    %c0_i32_0 = arith.constant 0 : i32
    %c0_i32_1 = arith.constant 0 : i32
    return %c0_i32, %c0_i32_0 : i32, i32
  }
  func.func @transform_4(%arg0: i32) -> (i32, i32) {
    %c0_i32 = arith.constant 0 : i32
    %c0_i32_0 = arith.constant 0 : i32
    return %arg0, %c0_i32 : i32, i32
  }
}

</mosaic_0001>

<bundles_post_ra>
// kernel: matmul_fused.1
= control target key start
LH: loop header
LB: loop body
LE: loop exit
PB: predicated region body
PF: predicated region fallthrough
CT: control target
= control target key end

     0   :  { %s1256_s15 = smov 0   ;;  %s1497_s0 = inlined_call_operand.vmem [shape: bf16[512,152], index: 0, kind: input, shape index: {}]   ;;  %s1498_s1 = inlined_call_operand.vmem [shape: bf16[152,64], index: 1, kind: input, shape index: {}]   ;;  %s1499_s2 = inlined_call_operand.vmem [shape: f32[1,64], index: 2, kind: input, shape index: {}]   ;;  %s1500_s3 = inlined_call_operand.vmem [shape: f32[1,64], index: 3, kind: input, shape index: {}]   ;;  %s1501_s4 = inlined_call_operand.vmem [shape: bf16[512,64], index: 4, kind: output, shape index: {}]  }
   0x1 LB: > { %s998_s16 = sadd.s32 4294967295, %s1228_s15   ;;  %p1002_p0 = scmp.ge.s32.totalorder %s1228_s15, 1  ;;  %s1228_s15 = sphi %s1256_s15, %s14_s15  }
   0x2   : > { %p164_p1 = scmp.lt.s32.totalorder %s1228_s15, 3 }
   0x4   : > { %p165_p2 = pnand %p1002_p0, %p164_p1 }
   0x5   : > { %s1003_s21 = sshll.u32 (!%p165_p2), %s998_s16, 5 }
   0x6   : > { %168 = sbr.rel (%p165_p2) target bundleno = 314 (0x13a), region = 36  ;;  %p192_p3 = scmp.lt.s32.totalorder (!%p165_p2), %s1003_s21, 63 }
   0xb   : > { %v1164_v0 = vld [vmem:[%s1498_s1 + $0x38] sm:$0xff]   ;;  %v1230_v1 = vmov 0   ;;  %v1165_v2 = vld [vmem:[%s1498_s1 + $0x30] sm:$0xff]   ;;  %s1503_s21 = smov (!%p192_p3, %s1003_s21), 63  ;;  %v1166_v3 = vld [vmem:[%s1498_s1 + $0x28] sm:$0xff]   ;;  %vm457_vm0 = vcmask 195584  }
   0xc   : > { %510 = vmatprep.subr.bf16.mxu0 %v1230_v1  ;;  %1135 = vmatprep.subr.bf16.mxu1 %v1230_v1  ;;  %s1102_s24 = sshll.u32 %s1503_s21, 3  ;;  %v1167_v4 = vld [vmem:[%s1498_s1 + $0x20] sm:$0xff]   ;;  %v1168_v7 = vld [vmem:[%s1498_s1 + $0x18] sm:$0xff]   ;;  %v1169_v8 = vld [vmem:[%s1498_s1 + $0x10] sm:$0xff]   ;;  %vm506_vm1 = vcmask 1043456   ;;  %s1007_s22 = sshll.u32 %s1503_s21, 2 }
   0xd   : > { %511 = vmatpush1.bf16.msra.mxu0 %v1164_v0  ;;  %1145 = vmatpush1.bf16.msra.mxu1 %v1164_v0  ;;  %s1279_s27 = scalar_lea.vmem %s1497_s0, %s1102_s24  ;;  %v1170_v9 = vld [vmem:[%s1498_s1 + $0x8] sm:$0xff]   ;;  %v1171_v10 = vld [vmem:[%s1498_s1] sm:$0xff]   ;;  %s1370_s25 = scalar_lea.vmem %s1501_s4, %s1007_s22  ;;  %vm909_vm2 = vcmask 519168  }
   0xe   : > { %512 = vmatprep.subr.bf16.mxu0 %v1230_v1  ;;  %1136 = vmatprep.subr.bf16.mxu1 %v1230_v1  ;;  %v1176_v5 = vld [vmem:[%s1279_s27 + $0x4] ss:$8 sps:$4 sm:$0xff]   ;;  %v1172_v11 = vld [vmem:[%s1498_s1 + $0x48] ss:$0 sps:$4 sm:$0xff]   ;;  %v1180_v16 = vld [vmem:[%s1279_s27 + $0x14] ss:$8 sps:$4 sm:$0xff]  }
   0xf   : > { %1050 = vmatprep.mubr.msk.bf16.mxu0 %vm457_vm0, %v1176_v5  ;;  %v1179_v6 = vld [vmem:[%s1279_s27 + $0x84] ss:$8 sps:$4 sm:$0xff]   ;;  %v508_v12 = vsel %vm506_vm1, %v1172_v11, 0  ;;  %v1174_v14 = vld [vmem:[%s1279_s27] ss:$8 sps:$4 sm:$0xff]  }
  0x10   : > { %1058 = vmatprep.mubr.msk.bf16.mxu1 %vm457_vm0, %v1179_v6  ;;  %v1173_v13 = vld [vmem:[%s1498_s1 + $0x40] sm:$0xff]   ;;  %v1182_v17 = vld [vmem:[%s1279_s27 + $0x94] ss:$8 sps:$4 sm:$0xff]   ;;  %v1184_v18 = vld [vmem:[%s1279_s27 + $0x10] ss:$8 sps:$4 sm:$0xff]  }
  0x11   : > { %513 = vmatpush1.bf16.msra.mxu0 %v1165_v2  ;;  %1146 = vmatpush1.bf16.msra.mxu1 %v1165_v2  ;;  %v1177_v15 = vld [vmem:[%s1279_s27 + $0x80] ss:$8 sps:$4 sm:$0xff]   ;;  %v1185_v19 = vld [vmem:[%s1279_s27 + $0x90] ss:$8 sps:$4 sm:$0xff]   ;;  %v1186_v20 = vld [vmem:[%s1279_s27 + $0x24] ss:$8 sps:$4 sm:$0xff]  }
  0x12   : > { %514 = vmatprep.subr.bf16.mxu0 %v1230_v1  ;;  %1137 = vmatprep.subr.bf16.mxu1 %v1230_v1  ;;  %v1188_v21 = vld [vmem:[%s1279_s27 + $0xa4] ss:$8 sps:$4 sm:$0xff]   ;;  %v1190_v22 = vld [vmem:[%s1279_s27 + $0x20] ss:$8 sps:$4 sm:$0xff]   ;;  %v1192_v24 = vld [vmem:[%s1279_s27 + $0x34] ss:$8 sps:$4 sm:$0xff]  }
  0x13   : > { %v1191_v23 = vld [vmem:[%s1279_s27 + $0xa0] ss:$8 sps:$4 sm:$0xff]   ;;  %v1194_v25 = vld [vmem:[%s1279_s27 + $0xb4] ss:$8 sps:$4 sm:$0xff]   ;;  %v1196_v26 = vld [vmem:[%s1279_s27 + $0x30] ss:$8 sps:$4 sm:$0xff]  }
  0x14   : > { %v1197_v27 = vld [vmem:[%s1279_s27 + $0xb0] ss:$8 sps:$4 sm:$0xff]   ;;  %v1198_v28 = vld [vmem:[%s1279_s27 + $0x44] ss:$8 sps:$4 sm:$0xff]   ;;  %v1202_v30 = vld [vmem:[%s1279_s27 + $0x40] ss:$8 sps:$4 sm:$0xff]  }
  0x15   : > { %515 = vmatpush1.bf16.msra.mxu0 %v1166_v3  ;;  %1147 = vmatpush1.bf16.msra.mxu1 %v1166_v3  ;;  %v1200_v29 = vld [vmem:[%s1279_s27 + $0xc4] ss:$8 sps:$4 sm:$0xff]   ;;  %v1203_v31 = vld [vmem:[%s1279_s27 + $0xc0] ss:$8 sps:$4 sm:$0xff]   ;;  %v1204_v32 = vld [vmem:[%s1279_s27 + $0x54] ss:$8 sps:$4 sm:$0xff]  }
  0x16   : > { %516 = vmatprep.subr.bf16.mxu0 %v1230_v1  ;;  %1138 = vmatprep.subr.bf16.mxu1 %v1230_v1  ;;  %v1206_v33 = vld [vmem:[%s1279_s27 + $0xd4] ss:$8 sps:$4 sm:$0xff]   ;;  %v1208_v34 = vld [vmem:[%s1279_s27 + $0x50] ss:$8 sps:$4 sm:$0xff]   ;;  %v1210_v36 = vld [vmem:[%s1279_s27 + $0x64] ss:$8 sps:$4 sm:$0xff]  }
  0x17   : > { %v1209_v35 = vld [vmem:[%s1279_s27 + $0xd0] ss:$8 sps:$4 sm:$0xff]   ;;  %v1212_v37 = vld [vmem:[%s1279_s27 + $0xe4] ss:$8 sps:$4 sm:$0xff]   ;;  %v1214_v38 = vld [vmem:[%s1279_s27 + $0x60] ss:$8 sps:$4 sm:$0xff]  }
  0x18   : > { %v1215_v39 = vld [vmem:[%s1279_s27 + $0xe0] ss:$8 sps:$4 sm:$0xff]   ;;  %v1216_v40 = vld [vmem:[%s1279_s27 + $0x74] ss:$8 sps:$4 sm:$0xff]   ;;  %v1220_v42 = vld [vmem:[%s1279_s27 + $0x70] ss:$8 sps:$4 sm:$0xff]  }
  0x19   : > { %517 = vmatpush1.bf16.msra.mxu0 %v1167_v4  ;;  %1148 = vmatpush1.bf16.msra.mxu1 %v1167_v4  ;;  %v1218_v41 = vld [vmem:[%s1279_s27 + $0xf4] ss:$8 sps:$4 sm:$0xff]   ;;  %v1221_v43 = vld [vmem:[%s1279_s27 + $0xf0] ss:$8 sps:$4 sm:$0xff]   ;;  %v1353_v44 = vld [vmem:[%s1499_s2] ss:$0 sm:$0xff] }
  0x1a   : > { %518 = vmatprep.subr.bf16.mxu0 %v1230_v1  ;;  %1139 = vmatprep.subr.bf16.mxu1 %v1230_v1  ;;  %v1358_v46 = vld [vmem:[%s1500_s3] ss:$0 sm:$0xff] }
  0x1d   : > { %519 = vmatpush1.bf16.msra.mxu0 %v1168_v7  ;;  %1149 = vmatpush1.bf16.msra.mxu1 %v1168_v7 }
  0x1e   : > { %520 = vmatprep.subr.bf16.mxu0 %v1230_v1  ;;  %1140 = vmatprep.subr.bf16.mxu1 %v1230_v1 }
  0x21   : > { %521 = vmatpush1.bf16.msra.mxu0 %v1169_v8  ;;  %1150 = vmatpush1.bf16.msra.mxu1 %v1169_v8 }
  0x22   : > { %522 = vmatprep.subr.bf16.mxu0 %v1230_v1  ;;  %1141 = vmatprep.subr.bf16.mxu1 %v1230_v1 }
  0x25   : > { %523 = vmatpush1.bf16.msra.mxu0 %v1170_v9  ;;  %1151 = vmatpush1.bf16.msra.mxu1 %v1170_v9 }
  0x26   : > { %524 = vmatprep.subr.bf16.mxu0 %v1230_v1  ;;  %1142 = vmatprep.subr.bf16.mxu1 %v1230_v1 }
  0x29   : > { %525 = vmatpush1.bf16.msra.mxu0 %v1171_v10  ;;  %1152 = vmatpush1.bf16.msra.mxu1 %v1171_v10 }
  0x2a   : > { %538 = vmatprep.subr.bf16.mxu0 %v1230_v1  ;;  %1143 = vmatprep.subr.bf16.mxu1 %v1230_v1 }
  0x2d   : > { %539 = vmatpush2.bf16.msra.mxu0 %v508_v12  ;;  %1153 = vmatpush2.bf16.msra.mxu1 %v508_v12 }
  0x2e   : > { %540 = vmatprep.subr.bf16.mxu0 %v1230_v1  ;;  %1144 = vmatprep.subr.bf16.mxu1 %v1230_v1 }
  0x31   : > { %541 = vmatpush2.bf16.msra.mxu0 %v1173_v13  ;;  %1154 = vmatpush2.bf16.msra.mxu1 %v1173_v13 }
  0x34   : > { %543 = vmatmul.mubr.bf16.vlgmr.msra.gmra.mxu0 %v1174_v14  ;;  %607 = vmatmul.mubr.bf16.vlgmr.msra.gmra.mxu1 %v1177_v15 }
  0x35   : > { %1051 = vmatprep.mubr.msk.bf16.mxu0 %vm457_vm0, %v1180_v16  ;;  %1059 = vmatprep.mubr.msk.bf16.mxu1 %vm457_vm0, %v1182_v17 }
  0x3c   : > { %551 = vmatmul.mubr.bf16.gmra.mxu0 %v1184_v18  ;;  %615 = vmatmul.mubr.bf16.gmra.mxu1 %v1185_v19 }
  0x3d   : > { %1052 = vmatprep.mubr.msk.bf16.mxu0 %vm457_vm0, %v1186_v20  ;;  %1060 = vmatprep.mubr.msk.bf16.mxu1 %vm457_vm0, %v1188_v21 }
  0x44   : > { %559 = vmatmul.mubr.bf16.gmra.mxu0 %v1190_v22  ;;  %623 = vmatmul.mubr.bf16.gmra.mxu1 %v1191_v23 }
  0x45   : > { %1053 = vmatprep.mubr.msk.bf16.mxu0 %vm457_vm0, %v1192_v24  ;;  %1061 = vmatprep.mubr.msk.bf16.mxu1 %vm457_vm0, %v1194_v25 }
  0x4c   : > { %567 = vmatmul.mubr.bf16.gmra.mxu0 %v1196_v26  ;;  %631 = vmatmul.mubr.bf16.gmra.mxu1 %v1197_v27 }
  0x4d   : > { %1054 = vmatprep.mubr.msk.bf16.mxu0 %vm457_vm0, %v1198_v28  ;;  %1062 = vmatprep.mubr.msk.bf16.mxu1 %vm457_vm0, %v1200_v29 }
  0x54   : > { %575 = vmatmul.mubr.bf16.gmra.mxu0 %v1202_v30  ;;  %639 = vmatmul.mubr.bf16.gmra.mxu1 %v1203_v31 }
  0x55   : > { %1055 = vmatprep.mubr.msk.bf16.mxu0 %vm457_vm0, %v1204_v32  ;;  %1063 = vmatprep.mubr.msk.bf16.mxu1 %vm457_vm0, %v1206_v33 }
  0x5c   : > { %583 = vmatmul.mubr.bf16.gmra.mxu0 %v1208_v34  ;;  %647 = vmatmul.mubr.bf16.gmra.mxu1 %v1209_v35 }
  0x5d   : > { %1056 = vmatprep.mubr.msk.bf16.mxu0 %vm457_vm0, %v1210_v36  ;;  %1064 = vmatprep.mubr.msk.bf16.mxu1 %vm457_vm0, %v1212_v37 }
  0x64   : > { %591 = vmatmul.mubr.bf16.gmra.mxu0 %v1214_v38  ;;  %655 = vmatmul.mubr.bf16.gmra.mxu1 %v1215_v39 }
  0x65   : > { %1057 = vmatprep.mubr.msk.bf16.mxu0 %vm457_vm0, %v1216_v40  ;;  %1065 = vmatprep.mubr.msk.bf16.mxu1 %vm457_vm0, %v1218_v41 }
  0x6c   : > { %599 = vmatmul.mubr.bf16.gmra.mxu0 %v1220_v42  ;;  %663 = vmatmul.mubr.bf16.gmra.mxu1 %v1221_v43 }
  0xf4   : > { %v544_v45 = vpop.f32.mrf.mxu0  ;;  %v608_v47 = vpop.f32.mrf.mxu1 }
  0xf5   : > { %v678_v48 = vmul.f32 %v1353_v44, %v544_v45  ;;  %v694_v49 = vmul.f32 %v1353_v44, %v608_v47 }
  0xf6   : > { %v546_v50 = vpop.f32.mrf.mxu0  ;;  %v610_v51 = vpop.f32.mrf.mxu1 }
  0xf7   : > { %v717_v52 = vadd.f32 %v1358_v46, %v678_v48  ;;  %v733_v53 = vadd.f32 %v1358_v46, %v694_v49 }
  0xf8   : > { %v547_v54 = vpop.f32.mrf.mxu0  ;;  %v611_v55 = vpop.f32.mrf.mxu1 }
  0xf9   : > { %v749_v56 = vmax.f32 %v717_v52, 0.0  ;;  %v765_v57 = vmax.f32 %v733_v53, 0.0  ;;  %v679_v58 = vmul.f32 %v1353_v44, %v547_v54  ;;  %v695_v59 = vmul.f32 %v1353_v44, %v611_v55 }
  0xfa   : > { %v549_v60 = vpop.f32.mrf.mxu0  ;;  %v613_v61 = vpop.f32.mrf.mxu1 }
  0xfb   : > { %v1103_v62 = vpack.c.bf16 %v749_v56, %v749_v56  ;;  %v1119_v63 = vpack.c.bf16 %v765_v57, %v765_v57  ;;  %v718_v0 = vadd.f32 %v1358_v46, %v679_v58  ;;  %v734_v1 = vadd.f32 %v1358_v46, %v695_v59 }
  0xfc   : > { %v552_v2 = vpop.f32.mrf.mxu0  ;;  %v616_v3 = vpop.f32.mrf.mxu1 }
  0xfd   : > { %910 = vst.msk [vmem:[%s1370_s25] sm:$0xf] %vm909_vm2, %v1103_v62  ;;  %926 = vst.msk [vmem:[%s1370_s25 + $0x40] sm:$0xf] %vm909_vm2, %v1119_v63  ;;  %v750_v4 = vmax.f32 %v718_v0, 0.0  ;;  %v766_v5 = vmax.f32 %v734_v1, 0.0  ;;  %v680_v6 = vmul.f32 %v1353_v44, %v552_v2  ;;  %v696_v7 = vmul.f32 %v1353_v44, %v616_v3 }
  0xfe   : > { %v554_v8 = vpop.f32.mrf.mxu0  ;;  %v618_v9 = vpop.f32.mrf.mxu1 }
  0xff   : > { %v1104_v10 = vpack.c.bf16 %v750_v4, %v750_v4  ;;  %v1120_v11 = vpack.c.bf16 %v766_v5, %v766_v5  ;;  %v719_v12 = vadd.f32 %v1358_v46, %v680_v6  ;;  %v735_v13 = vadd.f32 %v1358_v46, %v696_v7 }
 0x100   : > { %v555_v14 = vpop.f32.mrf.mxu0  ;;  %v619_v15 = vpop.f32.mrf.mxu1 }
 0x101   : > { %911 = vst.msk [vmem:[%s1370_s25 + $0x4] sm:$0xf] %vm909_vm2, %v1104_v10  ;;  %927 = vst.msk [vmem:[%s1370_s25 + $0x44] sm:$0xf] %vm909_vm2, %v1120_v11  ;;  %v751_v16 = vmax.f32 %v719_v12, 0.0  ;;  %v767_v17 = vmax.f32 %v735_v13, 0.0  ;;  %v681_v18 = vmul.f32 %v1353_v44, %v555_v14  ;;  %v697_v19 = vmul.f32 %v1353_v44, %v619_v15 }
 0x102   : > { %v557_v20 = vpop.f32.mrf.mxu0  ;;  %v621_v21 = vpop.f32.mrf.mxu1 }
 0x103   : > { %v1105_v22 = vpack.c.bf16 %v751_v16, %v751_v16  ;;  %v1121_v23 = vpack.c.bf16 %v767_v17, %v767_v17  ;;  %v720_v24 = vadd.f32 %v1358_v46, %v681_v18  ;;  %v736_v25 = vadd.f32 %v1358_v46, %v697_v19 }
 0x104   : > { %v560_v26 = vpop.f32.mrf.mxu0  ;;  %v624_v27 = vpop.f32.mrf.mxu1 }
 0x105   : > { %912 = vst.msk [vmem:[%s1370_s25 + $0x8] sm:$0xf] %vm909_vm2, %v1105_v22  ;;  %928 = vst.msk [vmem:[%s1370_s25 + $0x48] sm:$0xf] %vm909_vm2, %v1121_v23  ;;  %v752_v28 = vmax.f32 %v720_v24, 0.0  ;;  %v768_v29 = vmax.f32 %v736_v25, 0.0  ;;  %v682_v30 = vmul.f32 %v1353_v44, %v560_v26  ;;  %v698_v31 = vmul.f32 %v1353_v44, %v624_v27 }
 0x106   : > { %v562_v32 = vpop.f32.mrf.mxu0  ;;  %v626_v33 = vpop.f32.mrf.mxu1 }
 0x107   : > { %v1106_v34 = vpack.c.bf16 %v752_v28, %v752_v28  ;;  %v1122_v35 = vpack.c.bf16 %v768_v29, %v768_v29  ;;  %v721_v36 = vadd.f32 %v1358_v46, %v682_v30  ;;  %v737_v37 = vadd.f32 %v1358_v46, %v698_v31 }
 0x108   : > { %v563_v38 = vpop.f32.mrf.mxu0  ;;  %v627_v39 = vpop.f32.mrf.mxu1 }
 0x109   : > { %913 = vst.msk [vmem:[%s1370_s25 + $0xc] sm:$0xf] %vm909_vm2, %v1106_v34  ;;  %929 = vst.msk [vmem:[%s1370_s25 + $0x4c] sm:$0xf] %vm909_vm2, %v1122_v35  ;;  %v753_v40 = vmax.f32 %v721_v36, 0.0  ;;  %v769_v41 = vmax.f32 %v737_v37, 0.0  ;;  %v683_v42 = vmul.f32 %v1353_v44, %v563_v38  ;;  %v699_v43 = vmul.f32 %v1353_v44, %v627_v39 }
 0x10a   : > { %v565_v45 = vpop.f32.mrf.mxu0  ;;  %v629_v47 = vpop.f32.mrf.mxu1 }
 0x10b   : > { %v1107_v48 = vpack.c.bf16 %v753_v40, %v753_v40  ;;  %v1123_v49 = vpack.c.bf16 %v769_v41, %v769_v41  ;;  %v722_v50 = vadd.f32 %v1358_v46, %v683_v42  ;;  %v738_v51 = vadd.f32 %v1358_v46, %v699_v43 }
 0x10c   : > { %v568_v52 = vpop.f32.mrf.mxu0  ;;  %v632_v53 = vpop.f32.mrf.mxu1 }
 0x10d   : > { %914 = vst.msk [vmem:[%s1370_s25 + $0x10] sm:$0xf] %vm909_vm2, %v1107_v48  ;;  %930 = vst.msk [vmem:[%s1370_s25 + $0x50] sm:$0xf] %vm909_vm2, %v1123_v49  ;;  %v754_v54 = vmax.f32 %v722_v50, 0.0  ;;  %v770_v55 = vmax.f32 %v738_v51, 0.0  ;;  %v684_v56 = vmul.f32 %v1353_v44, %v568_v52  ;;  %v700_v57 = vmul.f32 %v1353_v44, %v632_v53 }
 0x10e   : > { %v570_v58 = vpop.f32.mrf.mxu0  ;;  %v634_v59 = vpop.f32.mrf.mxu1 }
 0x10f   : > { %v1108_v60 = vpack.c.bf16 %v754_v54, %v754_v54  ;;  %v1124_v61 = vpack.c.bf16 %v770_v55, %v770_v55  ;;  %v723_v62 = vadd.f32 %v1358_v46, %v684_v56  ;;  %v739_v63 = vadd.f32 %v1358_v46, %v700_v57 }
 0x110   : > { %v571_v0 = vpop.f32.mrf.mxu0  ;;  %v635_v1 = vpop.f32.mrf.mxu1 }
 0x111   : > { %915 = vst.msk [vmem:[%s1370_s25 + $0x14] sm:$0xf] %vm909_vm2, %v1108_v60  ;;  %931 = vst.msk [vmem:[%s1370_s25 + $0x54] sm:$0xf] %vm909_vm2, %v1124_v61  ;;  %v755_v2 = vmax.f32 %v723_v62, 0.0  ;;  %v771_v3 = vmax.f32 %v739_v63, 0.0  ;;  %v685_v4 = vmul.f32 %v1353_v44, %v571_v0  ;;  %v701_v5 = vmul.f32 %v1353_v44, %v635_v1 }
 0x112   : > { %v573_v6 = vpop.f32.mrf.mxu0  ;;  %v637_v7 = vpop.f32.mrf.mxu1 }
 0x113   : > { %v1109_v8 = vpack.c.bf16 %v755_v2, %v755_v2  ;;  %v1125_v9 = vpack.c.bf16 %v771_v3, %v771_v3  ;;  %v724_v10 = vadd.f32 %v1358_v46, %v685_v4  ;;  %v740_v11 = vadd.f32 %v1358_v46, %v701_v5 }
 0x114   : > { %v576_v12 = vpop.f32.mrf.mxu0  ;;  %v640_v13 = vpop.f32.mrf.mxu1 }
 0x115   : > { %916 = vst.msk [vmem:[%s1370_s25 + $0x18] sm:$0xf] %vm909_vm2, %v1109_v8  ;;  %932 = vst.msk [vmem:[%s1370_s25 + $0x58] sm:$0xf] %vm909_vm2, %v1125_v9  ;;  %v756_v14 = vmax.f32 %v724_v10, 0.0  ;;  %v772_v15 = vmax.f32 %v740_v11, 0.0  ;;  %v686_v16 = vmul.f32 %v1353_v44, %v576_v12  ;;  %v702_v17 = vmul.f32 %v1353_v44, %v640_v13 }
 0x116   : > { %v578_v18 = vpop.f32.mrf.mxu0  ;;  %v642_v19 = vpop.f32.mrf.mxu1 }
 0x117   : > { %v1110_v20 = vpack.c.bf16 %v756_v14, %v756_v14  ;;  %v1126_v21 = vpack.c.bf16 %v772_v15, %v772_v15  ;;  %v725_v22 = vadd.f32 %v1358_v46, %v686_v16  ;;  %v741_v23 = vadd.f32 %v1358_v46, %v702_v17 }
 0x118   : > { %v579_v24 = vpop.f32.mrf.mxu0  ;;  %v643_v25 = vpop.f32.mrf.mxu1 }
 0x119   : > { %917 = vst.msk [vmem:[%s1370_s25 + $0x1c] sm:$0xf] %vm909_vm2, %v1110_v20  ;;  %933 = vst.msk [vmem:[%s1370_s25 + $0x5c] sm:$0xf] %vm909_vm2, %v1126_v21  ;;  %v757_v26 = vmax.f32 %v725_v22, 0.0  ;;  %v773_v27 = vmax.f32 %v741_v23, 0.0  ;;  %v687_v28 = vmul.f32 %v1353_v44, %v579_v24  ;;  %v703_v29 = vmul.f32 %v1353_v44, %v643_v25 }
 0x11a   : > { %v581_v30 = vpop.f32.mrf.mxu0  ;;  %v645_v31 = vpop.f32.mrf.mxu1 }
 0x11b   : > { %v1111_v32 = vpack.c.bf16 %v757_v26, %v757_v26  ;;  %v1127_v33 = vpack.c.bf16 %v773_v27, %v773_v27  ;;  %v726_v34 = vadd.f32 %v1358_v46, %v687_v28  ;;  %v742_v35 = vadd.f32 %v1358_v46, %v703_v29 }
 0x11c   : > { %v584_v36 = vpop.f32.mrf.mxu0  ;;  %v648_v37 = vpop.f32.mrf.mxu1 }
 0x11d   : > { %918 = vst.msk [vmem:[%s1370_s25 + $0x20] sm:$0xf] %vm909_vm2, %v1111_v32  ;;  %934 = vst.msk [vmem:[%s1370_s25 + $0x60] sm:$0xf] %vm909_vm2, %v1127_v33  ;;  %v758_v38 = vmax.f32 %v726_v34, 0.0  ;;  %v774_v39 = vmax.f32 %v742_v35, 0.0  ;;  %v688_v40 = vmul.f32 %v1353_v44, %v584_v36  ;;  %v704_v41 = vmul.f32 %v1353_v44, %v648_v37 }
 0x11e   : > { %v586_v42 = vpop.f32.mrf.mxu0  ;;  %v650_v43 = vpop.f32.mrf.mxu1 }
 0x11f   : > { %v1112_v45 = vpack.c.bf16 %v758_v38, %v758_v38  ;;  %v1128_v47 = vpack.c.bf16 %v774_v39, %v774_v39  ;;  %v727_v48 = vadd.f32 %v1358_v46, %v688_v40  ;;  %v743_v49 = vadd.f32 %v1358_v46, %v704_v41 }
 0x120   : > { %v587_v50 = vpop.f32.mrf.mxu0  ;;  %v651_v51 = vpop.f32.mrf.mxu1 }
 0x121   : > { %919 = vst.msk [vmem:[%s1370_s25 + $0x24] sm:$0xf] %vm909_vm2, %v1112_v45  ;;  %935 = vst.msk [vmem:[%s1370_s25 + $0x64] sm:$0xf] %vm909_vm2, %v1128_v47  ;;  %v759_v52 = vmax.f32 %v727_v48, 0.0  ;;  %v775_v53 = vmax.f32 %v743_v49, 0.0  ;;  %v689_v54 = vmul.f32 %v1353_v44, %v587_v50  ;;  %v705_v55 = vmul.f32 %v1353_v44, %v651_v51 }
 0x122   : > { %v589_v56 = vpop.f32.mrf.mxu0  ;;  %v653_v57 = vpop.f32.mrf.mxu1 }
 0x123   : > { %v1113_v58 = vpack.c.bf16 %v759_v52, %v759_v52  ;;  %v1129_v59 = vpack.c.bf16 %v775_v53, %v775_v53  ;;  %v728_v60 = vadd.f32 %v1358_v46, %v689_v54  ;;  %v744_v61 = vadd.f32 %v1358_v46, %v705_v55 }
 0x124   : > { %v592_v62 = vpop.f32.mrf.mxu0  ;;  %v656_v63 = vpop.f32.mrf.mxu1 }
 0x125   : > { %920 = vst.msk [vmem:[%s1370_s25 + $0x28] sm:$0xf] %vm909_vm2, %v1113_v58  ;;  %936 = vst.msk [vmem:[%s1370_s25 + $0x68] sm:$0xf] %vm909_vm2, %v1129_v59  ;;  %v760_v0 = vmax.f32 %v728_v60, 0.0  ;;  %v776_v1 = vmax.f32 %v744_v61, 0.0  ;;  %v690_v2 = vmul.f32 %v1353_v44, %v592_v62  ;;  %v706_v3 = vmul.f32 %v1353_v44, %v656_v63 }
 0x126   : > { %v594_v4 = vpop.f32.mrf.mxu0  ;;  %v658_v5 = vpop.f32.mrf.mxu1 }
 0x127   : > { %v1114_v6 = vpack.c.bf16 %v760_v0, %v760_v0  ;;  %v1130_v7 = vpack.c.bf16 %v776_v1, %v776_v1  ;;  %v729_v8 = vadd.f32 %v1358_v46, %v690_v2  ;;  %v745_v9 = vadd.f32 %v1358_v46, %v706_v3 }
 0x128   : > { %v595_v10 = vpop.f32.mrf.mxu0  ;;  %v659_v11 = vpop.f32.mrf.mxu1 }
 0x129   : > { %921 = vst.msk [vmem:[%s1370_s25 + $0x2c] sm:$0xf] %vm909_vm2, %v1114_v6  ;;  %937 = vst.msk [vmem:[%s1370_s25 + $0x6c] sm:$0xf] %vm909_vm2, %v1130_v7  ;;  %v761_v12 = vmax.f32 %v729_v8, 0.0  ;;  %v777_v13 = vmax.f32 %v745_v9, 0.0  ;;  %v691_v14 = vmul.f32 %v1353_v44, %v595_v10  ;;  %v707_v15 = vmul.f32 %v1353_v44, %v659_v11 }
 0x12a   : > { %v597_v16 = vpop.f32.mrf.mxu0  ;;  %v661_v17 = vpop.f32.mrf.mxu1 }
 0x12b   : > { %v1115_v18 = vpack.c.bf16 %v761_v12, %v761_v12  ;;  %v1131_v19 = vpack.c.bf16 %v777_v13, %v777_v13  ;;  %v730_v20 = vadd.f32 %v1358_v46, %v691_v14  ;;  %v746_v21 = vadd.f32 %v1358_v46, %v707_v15 }
 0x12c   : > { %v600_v22 = vpop.f32.mrf.mxu0  ;;  %v664_v23 = vpop.f32.mrf.mxu1 }
 0x12d   : > { %922 = vst.msk [vmem:[%s1370_s25 + $0x30] sm:$0xf] %vm909_vm2, %v1115_v18  ;;  %938 = vst.msk [vmem:[%s1370_s25 + $0x70] sm:$0xf] %vm909_vm2, %v1131_v19  ;;  %v762_v24 = vmax.f32 %v730_v20, 0.0  ;;  %v778_v25 = vmax.f32 %v746_v21, 0.0  ;;  %v692_v26 = vmul.f32 %v1353_v44, %v600_v22  ;;  %v708_v27 = vmul.f32 %v1353_v44, %v664_v23 }
 0x12e   : > { %v602_v28 = vpop.f32.mrf.mxu0  ;;  %v666_v29 = vpop.f32.mrf.mxu1 }
 0x12f   : > { %v1116_v30 = vpack.c.bf16 %v762_v24, %v762_v24  ;;  %v1132_v31 = vpack.c.bf16 %v778_v25, %v778_v25  ;;  %v731_v32 = vadd.f32 %v1358_v46, %v692_v26  ;;  %v747_v33 = vadd.f32 %v1358_v46, %v708_v27 }
 0x130   : > { %v603_v34 = vpop.f32.mrf.mxu0  ;;  %v667_v35 = vpop.f32.mrf.mxu1 }
 0x131   : > { %923 = vst.msk [vmem:[%s1370_s25 + $0x34] sm:$0xf] %vm909_vm2, %v1116_v30  ;;  %939 = vst.msk [vmem:[%s1370_s25 + $0x74] sm:$0xf] %vm909_vm2, %v1132_v31  ;;  %v763_v36 = vmax.f32 %v731_v32, 0.0  ;;  %v779_v37 = vmax.f32 %v747_v33, 0.0  ;;  %v693_v38 = vmul.f32 %v1353_v44, %v603_v34  ;;  %v709_v39 = vmul.f32 %v1353_v44, %v667_v35 }
 0x132   : > { %v605_v40 = vpop.f32.mrf.mxu0  ;;  %v669_v41 = vpop.f32.mrf.mxu1 }
 0x133   : > { %v1117_v42 = vpack.c.bf16 %v763_v36, %v763_v36  ;;  %v1133_v43 = vpack.c.bf16 %v779_v37, %v779_v37  ;;  %v732_v45 = vadd.f32 %v1358_v46, %v693_v38  ;;  %v748_v47 = vadd.f32 %v1358_v46, %v709_v39 }
 0x135   : > { %924 = vst.msk [vmem:[%s1370_s25 + $0x38] sm:$0xf] %vm909_vm2, %v1117_v42  ;;  %940 = vst.msk [vmem:[%s1370_s25 + $0x78] sm:$0xf] %vm909_vm2, %v1133_v43  ;;  %v764_v48 = vmax.f32 %v732_v45, 0.0  ;;  %v780_v49 = vmax.f32 %v748_v47, 0.0 }
 0x137   : > { %v1118_v50 = vpack.c.bf16 %v764_v48, %v764_v48  ;;  %v1134_v51 = vpack.c.bf16 %v780_v49, %v780_v49 }
 0x139   : > { %925 = vst.msk [vmem:[%s1370_s25 + $0x3c] sm:$0xf] %vm909_vm2, %v1118_v50  ;;  %941 = vst.msk [vmem:[%s1370_s25 + $0x7c] sm:$0xf] %vm909_vm2, %v1134_v51 }
 0x13a PF: > { %s14_s15 = sadd.s32 1, %s1228_s15  }
 0x13b   : > { %p11_p4 = scmp.ge.s32.totalorder %s14_s15, 4  }
 0x13d   :  { %13 = sbr.rel (!%p11_p4) target bundleno = 1 (0x1), region = 66 }

</bundles_post_ra>
